<compile_context>
chip_gen: v7x
topology: tpu7x:2x2x1
jax: 0.10.0
libtpu: 0.0.40
codegen_flags: <defaults>
</compile_context>

<pallas_src>
import functools

import jax
import jax.numpy as jnp
from jax import lax
from jax.experimental import pallas as pl
from jax.experimental.pallas import tpu as pltpu

_MIB = 1024 * 1024
_K_SINGLE_PASS_MAX = 2048          # padded K <= this -> single-K fast path
_X_RESIDENT_BUDGET = 12 * _MIB     # max double-buffered bytes for K-resident x


def _round_up(x, m):
    return (x + m - 1) // m * m


def _largest_tile(dim, cap):
    """Largest multiple-of-128 divisor of `dim` that is <= cap (dim % 128 == 0)."""
    best = 128
    t = 128
    while t <= min(dim, cap):
        if dim % t == 0:
            best = t
        t += 128
    return best


def _sublane_tile(dtype):
    # Native second-minor tile per packed dtype: f32 -> 8, bf16 -> 16, int8/fp8 -> 32.
    return {4: 8, 2: 16, 1: 32}.get(jnp.dtype(dtype).itemsize, 8)


# --------------------------- kernels ---------------------------

def _linear_kernel_single_k(x_ref, w_ref, b_ref, o_ref):
    """One (tm, tn) output tile; whole K contraction in one MXU pass.

    x_ref: (tm, Dp), w_ref: (tn, Dp) -> contract last dims (W kept in PyTorch
    (out, in) layout, no transpose anywhere). Bias add + downcast fused into
    the single store; no accumulator scratch round-trip.
    """
    acc = lax.dot_general(
        x_ref[...], w_ref[...],
        dimension_numbers=(((1,), (1,)), ((), ())),
        preferred_element_type=jnp.float32)
    o_ref[...] = (acc + b_ref[...].astype(jnp.float32)).astype(o_ref.dtype)


def _make_linear_kernel_multi_k(tk, x_resident):
    """(tm, tn) output tile accumulated over the K grid axis (axis 2)."""

    def kernel(x_ref, w_ref, b_ref, o_ref, acc_ref):
        k = pl.program_id(2)

        @pl.when(k == 0)
        def _():
            acc_ref[...] = jnp.zeros_like(acc_ref)

        if x_resident:
            # x tile stays VMEM-resident across the whole K sweep; slice the
            # current K chunk (128-aligned start).
            start = pl.multiple_of(k * tk, 128)
            x_blk = x_ref[:, pl.ds(start, tk)]
        else:
            x_blk = x_ref[...]

        acc_ref[...] += lax.dot_general(
            x_blk, w_ref[...],
            dimension_numbers=(((1,), (1,)), ((), ())),
            preferred_element_type=jnp.float32)

        @pl.when(k == pl.num_programs(2) - 1)
        def _():
            o_ref[...] = (acc_ref[...] + b_ref[...].astype(jnp.float32)
                          ).astype(o_ref.dtype)

    return kernel


# --------------------------- wrapper ---------------------------

def prepare_linear_params(weight, bias):
    """One-time parameter prep (call at setup, NOT per forward).

    weight: (out, in) PyTorch layout, bias: (out,). Both feature dims are
    zero-padded up to lane-dense multiples of 128. No transpose: the kernel
    contracts the last (in) dim of x and W directly.
    """
    d_out, d_in = weight.shape
    dp_out = _round_up(d_out, 128)
    dp_in = _round_up(d_in, 128)
    if (dp_out, dp_in) != (d_out, d_in):
        weight = jnp.pad(weight, ((0, dp_out - d_out), (0, dp_in - d_in)))
    if dp_out != d_out:
        bias = jnp.pad(bias, (0, dp_out - d_out))
    return weight, bias.reshape(1, dp_out)


@functools.partial(jax.jit, static_argnames=("d_out",))
def _linear_adapter_apply(x, w_p, b_p, *, d_out):
    """y = x @ W.T + b on pre-padded params; slices back to (B, d_out)."""
    B, D = x.shape
    dp_out, dp_in = w_p.shape
    assert dp_in == _round_up(D, 128), "weight not prepared for this input dim"

    isz = x.dtype.itemsize
    wsz = w_p.dtype.itemsize
    osz = isz
    sub = _sublane_tile(x.dtype)

    # ---- batch (M) tiling ----
    if B <= 512:
        tm = _round_up(B, sub)
        Bp = tm
    else:
        tm = 512
        Bp = _round_up(B, tm)

    single_k = dp_in <= _K_SINGLE_PASS_MAX

    # ---- N tiling (output features) ----
    tn = _largest_tile(dp_out, 1024 if single_k else 512)
    # v7x has 2 TensorCores; make sure the parallel grid has >= 2 blocks when
    # the feature dim allows a 128-aligned split.
    if (Bp // tm) * (dp_out // tn) < 2:
        tn = _largest_tile(dp_out, dp_out // 2)   # no-op if dp_out == 128

    # ---- pad activations only (weights/bias already padded at setup) ----
    if (Bp, dp_in) != (B, D):
        x = jnp.pad(x, ((0, Bp - B), (0, dp_in - D)))

    grid_m, grid_n = Bp // tm, dp_out // tn

    if single_k:
        grid = (grid_m, grid_n)
        in_specs = [
            pl.BlockSpec((tm, dp_in), lambda i, j: (i, 0)),   # x: full K, per M tile
            pl.BlockSpec((tn, dp_in), lambda i, j: (j, 0)),   # W (out, in) tile
            pl.BlockSpec((1, tn), lambda i, j: (0, j)),       # bias tile
        ]
        out_spec = pl.BlockSpec((tm, tn), lambda i, j: (i, j))
        scratch = []
        kernel = _linear_kernel_single_k
        semantics = ("parallel", "parallel")
        footprint = 2 * (tm * dp_in * isz + tn * dp_in * wsz
                         + tn * b_p.dtype.itemsize + tm * tn * osz)
    else:
        tk = _largest_tile(dp_in, 1024)
        x_resident = 2 * tm * dp_in * isz <= _X_RESIDENT_BUDGET
        grid = (grid_m, grid_n, dp_in // tk)
        if x_resident:
            x_spec = pl.BlockSpec((tm, dp_in), lambda i, j, k: (i, 0))
            x_bytes = 2 * tm * dp_in * isz
        else:
            x_spec = pl.BlockSpec((tm, tk), lambda i, j, k: (i, k))
            x_bytes = 2 * tm * tk * isz
        in_specs = [
            x_spec,
            pl.BlockSpec((tn, tk), lambda i, j, k: (j, k)),   # W (out, in) tile
            pl.BlockSpec((1, tn), lambda i, j, k: (0, j)),    # bias tile
        ]
        out_spec = pl.BlockSpec((tm, tn), lambda i, j, k: (i, j))
        scratch = [pltpu.VMEM((tm, tn), jnp.float32)]
        kernel = _make_linear_kernel_multi_k(tk, x_resident)
        semantics = ("parallel", "parallel", "arbitrary")
        footprint = (x_bytes
                     + 2 * (tn * tk * wsz + tn * b_p.dtype.itemsize
                            + tm * tn * osz)
                     + tm * tn * 4)

    # VMEM limit from the real double-buffered footprint (+ headroom), capped
    # at 40 MiB so it stays safe on v7x's 64 MiB/TC part.
    vmem_limit = int(min(max(footprint + 4 * _MIB, 16 * _MIB), 40 * _MIB))

    cost = pl.CostEstimate(
        flops=2 * Bp * dp_out * dp_in,
        transcendentals=0,
        bytes_accessed=(Bp * dp_in * isz                          # x read once per M tile
                        + grid_m * dp_out * dp_in * wsz           # W streamed once per M tile
                        + dp_out * b_p.dtype.itemsize
                        + Bp * dp_out * osz),
    )

    y_p = pl.pallas_call(
        kernel,
        out_shape=jax.ShapeDtypeStruct((Bp, dp_out), x.dtype),
        grid_spec=pltpu.PrefetchScalarGridSpec(
            num_scalar_prefetch=0,
            grid=grid,
            in_specs=in_specs,
            out_specs=out_spec,
            scratch_shapes=scratch,
        ),
        compiler_params=pltpu.CompilerParams(
            dimension_semantics=semantics,
            vmem_limit_bytes=vmem_limit,
        ),
        cost_estimate=cost,
    )(x, w_p, b_p)

    return y_p[:B, :d_out]


def linear_adapter(x, weight, bias):
    """Full forward: one-time param prep + kernel apply.

    In a real model, call `prepare_linear_params` once at parameter-setup time
    and reuse the padded params across every forward call (the per-call path
    contains no weight transpose or weight padding).
    """
    d_out = weight.shape[0]
    w_p, b_p = prepare_linear_params(weight, bias)
    return _linear_adapter_apply(x, w_p, b_p, d_out=d_out)


if __name__ == "__main__":
    key = jax.random.PRNGKey(0)
    k_x, k_w, k_b = jax.random.split(key, 3)

    batch, input_dim = 8, 32

    x = jax.random.normal(k_x, (batch, input_dim), dtype=jnp.float32)
    # Deterministic synthetic parameters (PyTorch-shaped: weight (out, in), bias (out,))
    bound = 1.0 / (input_dim ** 0.5)
    weight = jax.random.uniform(k_w, (input_dim, input_dim),
                                minval=-bound, maxval=bound, dtype=jnp.float32)
    bias = jax.random.uniform(k_b, (input_dim,),
                              minval=-bound, maxval=bound, dtype=jnp.float32)

    # One-time parameter prep, then the per-call path (no weight transpose/pad).
    w_p, b_p = prepare_linear_params(weight, bias)
    y = _linear_adapter_apply(x, w_p, b_p, d_out=input_dim)
    jax.block_until_ready(y)

    # Correctness check against plain-JAX reference (same semantics as nn.Linear).
    y_ref = x @ weight.T + bias
    assert y.shape == y_ref.shape, "shape mismatch vs reference"
    assert jnp.allclose(y, y_ref, atol=2e-5, rtol=2e-5), "mismatch vs reference"

    print("KERNEL_OK")
</pallas_src>

<mosaic_0001>
module attributes {stable_mosaic.version = 11 : i64} {
  func.func @_linear_kernel_single_k(%arg0: i32, %arg1: i32, %arg2: memref<8x128xf32, #tpu.memory_space<vmem>>, %arg3: memref<128x128xf32, #tpu.memory_space<vmem>>, %arg4: memref<1x128xf32, #tpu.memory_space<vmem>>, %arg5: memref<8x128xf32, #tpu.memory_space<vmem>>) attributes {dimension_semantics = [#tpu.dimension_semantics<parallel>, #tpu.dimension_semantics<parallel>], iteration_bounds = array<i64: 1, 1>, scalar_prefetch = 0 : i64, scratch_operands = 0 : i64, tpu.core_type = #tpu.core_type<tc>, window_params = [{transform_indices = @transform_0, window_bounds = array<i64: 8, 128>}, {transform_indices = @transform_1, window_bounds = array<i64: 128, 128>}, {transform_indices = @transform_2, window_bounds = array<i64: 1, 128>}, {transform_indices = @transform_3, window_bounds = array<i64: 8, 128>}]} {
    %c0 = arith.constant 0 : index
    %c0_0 = arith.constant 0 : index
    %0 = vector.load %arg2[%c0, %c0_0] : memref<8x128xf32, #tpu.memory_space<vmem>>, vector<8x128xf32>
    %c0_1 = arith.constant 0 : index
    %c0_2 = arith.constant 0 : index
    %1 = vector.load %arg3[%c0_1, %c0_2] : memref<128x128xf32, #tpu.memory_space<vmem>>, vector<128x128xf32>
    %cst = arith.constant dense<0.000000e+00> : vector<8x128xf32>
    %2 = tpu.matmul %0, %1, %cst {dimension_numbers = #tpu.dot_dimension_numbers<[1], [1], [0], [0], [0, 0, 1, 0], [], []>} : vector<8x128xf32>, vector<128x128xf32>, vector<8x128xf32> -> vector<8x128xf32>
    %c0_3 = arith.constant 0 : index
    %c0_4 = arith.constant 0 : index
    %3 = vector.load %arg4[%c0_3, %c0_4] : memref<1x128xf32, #tpu.memory_space<vmem>>, vector<1x128xf32>
    %4 = vector.broadcast %3 : vector<1x128xf32> to vector<8x128xf32>
    %5 = arith.addf %2, %4 : vector<8x128xf32>
    %c0_5 = arith.constant 0 : index
    %c0_6 = arith.constant 0 : index
    %6 = vector.load %arg5[%c0_5, %c0_6] : memref<8x128xf32, #tpu.memory_space<vmem>>, vector<8x128xf32>
    tpu.vector_store %arg5[%c0_5, %c0_6], %5 {strides = array<i32>} : memref<8x128xf32, #tpu.memory_space<vmem>>, vector<8x128xf32>,
    return
  }
  func.func @transform_0(%arg0: i32, %arg1: i32) -> (i32, i32) {
    %c0_i32 = arith.constant 0 : i32
    %c0_i32_0 = arith.constant 0 : i32
    return %arg0, %c0_i32 : i32, i32
  }
  func.func @transform_1(%arg0: i32, %arg1: i32) -> (i32, i32) {
    %c0_i32 = arith.constant 0 : i32
    %c0_i32_0 = arith.constant 0 : i32
    return %arg1, %c0_i32 : i32, i32
  }
  func.func @transform_2(%arg0: i32, %arg1: i32) -> (i32, i32) {
    %c0_i32 = arith.constant 0 : i32
    %c0_i32_0 = arith.constant 0 : i32
    return %c0_i32, %arg1 : i32, i32
  }
  func.func @transform_3(%arg0: i32, %arg1: i32) -> (i32, i32) {
    %c0_i32 = arith.constant 0 : i32
    return %arg0, %arg1 : i32, i32
  }
}

</mosaic_0001>

<bundles_post_ra>
// kernel: _linear_adapter_apply.1
= control target key start
LH: loop header
LB: loop body
LE: loop exit
PB: predicated region body
PF: predicated region fallthrough
CT: control target
= control target key end

     0   :  { %8 = vsyncpa [#allocation3], 0  ;;  %s328_s0 = inlined_call_operand.vmem [shape: f32[8,128], index: 0, kind: input, shape index: {}]   ;;  %s329_s1 = inlined_call_operand.hbm [shape: f32[128,128], index: 1, kind: input, shape index: {}]   ;;  %s330_s2 = inlined_call_operand.vmem [shape: f32[1,128], index: 2, kind: input, shape index: {}]   ;;  %s331_s3 = inlined_call_operand.hbm [shape: f32[8,128], index: 3, kind: output, shape index: {}]  }
   0x1   :  { %9 = vsyncpa [#allocation4], 0  ;;  %s271_s12 = smov [#allocation2]   ;;  %s223_s16 = scalar_lea.hbm %s329_s1, 2048 }
   0x2   :  { %s17_s13 = sshll.u32 %s271_s12, 4  ;;  %p224_p0 = scmp.ne.s32.totalorder %s329_s1, %s223_s16  ;;  %s18_s13 = int_to_ptr.vmem [resolvable:$true] %s17_s13 }
   0x3   :  { %p227_p1 = scmp.lt.u32.totalorder %s223_s16, %s329_s1 }
   0x5   :  { %p229_p2 = pnand %p227_p1, %p224_p0 }
   0x7   :  { %232 = shalt.err (!%p229_p2)
}
   0x8   :  { %s233_s21 = scalar_lea.vmem %s18_s13, 2048  ;;  %p238_p4 = scmp.lt.s32.totalorder %s18_s13, %s18_s13 }
   0x9   :  { %p234_p3 = scmp.ne.s32.totalorder %s18_s13, %s233_s21  ;;  %p239_p5 = scmp.lt.s32.totalorder %s233_s21, %s233_s21 }
   0xb   :  { %p240_p6 = por %p239_p5, %p238_p4 }
   0xd   :  { %p241_p7 = pnand %p240_p6, %p234_p3 }
   0xf   :  { %244 = shalt.err (!%p241_p7)
}
  0x10   :  { %s272_s22 = smov 128   ;;  %s273_s23 = smov 8  }
  0x11   :  { %23 = dma.hbm_to_vmem [thread:$0]  %s329_s1, 2048, %s18_s13, [#allocation3], %s272_s22, %s272_s22, %s273_s23  }
  0x12   :  { %267 = dma.done.wait [#allocation3], 2048  }
  0x13   :  { %268 = vsyncadd [#allocation3], 4294965248  ;;  %v274_v0 = vmov 0.0|0.0   ;;  %vm275_vm0 = vmmov 0   ;;  %v276_v1 = vmov 0.0   ;;  %v30_v2 = vld [vmem:[#allocation2] sm:$0xff] }
  0x14   :  { %192 = vmatprep.subr.bf16.mxu0 %v274_v0  ;;  %189 = vmatprep.mubr.msk.f32.mxu0 %vm275_vm0, %v276_v1  ;;  %v31_v3 = vld [vmem:[#allocation2 + $0x8] sm:$0xff]  ;;  %v32_v5 = vld [vmem:[#allocation2 + $0x10] sm:$0xff]  ;;  %v33_v6 = vld [vmem:[#allocation2 + $0x18] sm:$0xff]  ;;  %s277_s29 = smov [#allocation5]  }
  0x15   :  { %v193_v4 = vpack.c.bf16 %v31_v3, %v30_v2  ;;  %v196_v7 = vpack.c.bf16 %v33_v6, %v32_v5  ;;  %v34_v8 = vld [vmem:[#allocation2 + $0x20] sm:$0xff]  ;;  %v35_v9 = vld [vmem:[#allocation2 + $0x28] sm:$0xff]  ;;  %v36_v11 = vld [vmem:[#allocation2 + $0x30] sm:$0xff]  ;;  %s130_s30 = sshll.u32 %s277_s29, 4  ;;  %s131_s30 = int_to_ptr.vmem [resolvable:$true] %s130_s30 }
  0x16   :  { %v199_v10 = vpack.c.bf16 %v35_v9, %v34_v8  ;;  %v37_v12 = vld [vmem:[#allocation2 + $0x38] sm:$0xff]  ;;  %v38_v14 = vld [vmem:[#allocation2 + $0x40] sm:$0xff]  ;;  %v39_v15 = vld [vmem:[#allocation2 + $0x48] sm:$0xff]  ;;  %s245_s4 = scalar_lea.vmem %s131_s30, 128  ;;  %p250_p9 = scmp.lt.s32.totalorder %s131_s30, %s131_s30 }
  0x17   :  { %194 = vmatpush3.bf16.xpose.msra.mxu0 %v193_v4  ;;  %v202_v13 = vpack.c.bf16 %v37_v12, %v36_v11  ;;  %v205_v16 = vpack.c.bf16 %v39_v15, %v38_v14  ;;  %v40_v17 = vld [vmem:[#allocation2 + $0x50] sm:$0xff]  ;;  %v41_v18 = vld [vmem:[#allocation2 + $0x58] sm:$0xff]  ;;  %v42_v20 = vld [vmem:[#allocation2 + $0x60] sm:$0xff]  ;;  %p246_p8 = scmp.ne.s32.totalorder %s131_s30, %s245_s4  ;;  %p251_p10 = scmp.lt.s32.totalorder %s245_s4, %s245_s4 }
  0x18   :  { %195 = vmatprep.subr.bf16.mxu0 %v274_v0  ;;  %v208_v19 = vpack.c.bf16 %v41_v18, %v40_v17  ;;  %v43_v21 = vld [vmem:[#allocation2 + $0x68] sm:$0xff]  ;;  %v44_v23 = vld [vmem:[#allocation2 + $0x70] sm:$0xff]  ;;  %v45_v24 = vld [vmem:[#allocation2 + $0x78] sm:$0xff] }
  0x19   :  { %v211_v22 = vpack.c.bf16 %v43_v21, %v42_v20  ;;  %v214_v25 = vpack.c.bf16 %v45_v24, %v44_v23  ;;  %v29_v26 = vld [vmem:[%s328_s0] sm:$0xff]  ;;  %p252_p11 = por %p251_p10, %p250_p9 }
  0x1a   :  { %v139_v27 = vld [vmem:[%s330_s2] ss:$0 sm:$0xff] }
  0x1b   :  { %p253_p12 = pnand %p252_p11, %p246_p8 }
  0x1f   :  { %197 = vmatpush3.bf16.xpose.msra.mxu0 %v196_v7 }
  0x20   :  { %198 = vmatprep.subr.bf16.mxu0 %v274_v0 }
  0x27   :  { %200 = vmatpush3.bf16.xpose.msra.mxu0 %v199_v10 }
  0x28   :  { %201 = vmatprep.subr.bf16.mxu0 %v274_v0 }
  0x2f   :  { %203 = vmatpush3.bf16.xpose.msra.mxu0 %v202_v13 }
  0x30   :  { %204 = vmatprep.subr.bf16.mxu0 %v274_v0 }
  0x37   :  { %206 = vmatpush3.bf16.xpose.msra.mxu0 %v205_v16 }
  0x38   :  { %207 = vmatprep.subr.bf16.mxu0 %v274_v0 }
  0x3f   :  { %209 = vmatpush3.bf16.xpose.msra.mxu0 %v208_v19 }
  0x40   :  { %210 = vmatprep.subr.bf16.mxu0 %v274_v0 }
  0x47   :  { %212 = vmatpush3.bf16.xpose.msra.mxu0 %v211_v22 }
  0x48   :  { %213 = vmatprep.subr.bf16.mxu0 %v274_v0 }
  0x4f   :  { %215 = vmatpush3.bf16.xpose.msra.mxu0 %v214_v25 }
  0x56   :  { %190 = vmatmul.mubr.f32.vlgmr.msra.gmra.mrb[0].mxu0 %v29_v26 }
 0x129   :  { %v119_v28 = vpop.f32.mrb[0].mxu0 }
 0x12a   :  { %v120_v29 = vadd.f32 %v139_v27, %v119_v28  ;;  %v191_v30 = vpop.f32.mrb[1].mxu0 }
 0x12c   :  { %123 = vst [vmem:[#allocation5] sm:$0xff] %v120_v29 }
 0x12d   :  { %256 = shalt.err (!%p253_p12)
}
 0x12e   :  { %s257_s6 = scalar_lea.hbm %s331_s3, 128 }
 0x12f   :  { %p258_p13 = scmp.ne.s32.totalorder %s331_s3, %s257_s6  ;;  %p261_p0 = scmp.lt.u32.totalorder %s257_s6, %s331_s3 }
 0x131   :  { %p263_p1 = pnand %p261_p0, %p258_p13 }
 0x133   :  { %266 = shalt.err (!%p263_p1)
}
 0x134   :  { %133 = dma.vmem_to_hbm [thread:$0]  %s131_s30, 128, %s331_s3, [#allocation4]  }
 0x135   :  { %269 = dma.done.wait [#allocation4], 128  }
 0x136   :  { %270 = vsyncadd [#allocation4], 4294967168 }
 0x137   :  { %137 = vsyncpa [#allocation3], 1 }
 0x138   :  { %138 = vsyncpa [#allocation4], 1 }

</bundles_post_ra>
